<compile_context>
chip_gen: v5e
topology: v5e:2x2
jax: 0.10.0
libtpu: 0.0.40
codegen_flags: <defaults>
</compile_context>

<pallas_src>
import functools

import jax
import jax.numpy as jnp
from jax.experimental import pallas as pl
from jax.experimental.pallas import tpu as pltpu


def policy_net_kernel(x_ref, w1_ref, b1_ref, w2_ref, b2_ref, out_ref, *, action_dim):
    # ---- fc1 + ReLU (MXU + VPU) ----
    x = x_ref[...]                                           # (TB, S)
    h = jnp.dot(x, w1_ref[...], preferred_element_type=jnp.float32)
    h = jnp.maximum(h + b1_ref[...], 0.0)                    # (TB, H)

    # ---- fc2 (MXU), action dim padded to a lane-dense multiple of 128 ----
    logits = jnp.dot(h, w2_ref[...], preferred_element_type=jnp.float32)
    logits = logits + b2_ref[...]                            # (TB, A_pad)

    a_pad = logits.shape[-1]
    if a_pad == action_dim:
        # No padded lanes: plain numerically stable softmax.
        m = jnp.max(logits, axis=-1, keepdims=True)
        e = jnp.exp(logits - m)
    else:
        # Mask padded lanes out of both the max and the exp. Taking exp of the
        # masked logits makes padded lanes exactly 0 with no transient inf.
        col = jax.lax.broadcasted_iota(jnp.int32, logits.shape, 1)
        masked = jnp.where(col < action_dim, logits, -1e30)
        m = jnp.max(masked, axis=-1, keepdims=True)
        e = jnp.exp(masked - m)

    denom = jnp.sum(e, axis=-1, keepdims=True)
    # EUP approximate reciprocal + one Newton-Raphson step (~f32-exact).
    r = pl.reciprocal(denom, approx=True)
    r = r * (2.0 - denom * r)
    # Lane-dense store: full A_pad width written, padded lanes carry zeros.
    out_ref[...] = (e * r).astype(out_ref.dtype)


def policy_net_forward(x, w1_t, b1, w2_t, b2, *, tb_max=512):
    """x: (B, state_dim) f32; w1_t: (state_dim, hidden); w2_t: (hidden, action).
    Returns softmax probabilities (B, action_dim) f32."""
    B, S = x.shape
    H = w1_t.shape[1]
    A = w2_t.shape[1]

    # Pad action dim to a multiple of 128 lanes (zero weight cols / bias cols;
    # the kernel masks those lanes out of the softmax).
    A_pad = pl.cdiv(A, 128) * 128
    if A_pad != A:
        w2_t = jnp.pad(w2_t, ((0, 0), (0, A_pad - A)))
        b2 = jnp.pad(b2, ((0, 0), (0, A_pad - A)))

    # Batch tile: large batches get tb_max-row tiles (mem-bound sweet spot);
    # small batches get a single tile rounded up to the 8-row sublane quantum.
    if B >= tb_max:
        TB = tb_max
    else:
        TB = ((B + 7) // 8) * 8
    Bp = pl.cdiv(B, TB) * TB
    if Bp != B:
        x = jnp.pad(x, ((0, Bp - B), (0, 0)))

    grid = (Bp // TB,)
    kernel = functools.partial(policy_net_kernel, action_dim=A)

    out = pl.pallas_call(
        kernel,
        out_shape=jax.ShapeDtypeStruct((Bp, A_pad), jnp.float32),
        grid_spec=pl.GridSpec(
            grid=grid,
            in_specs=[
                pl.BlockSpec((TB, S), lambda i: (i, 0)),        # x: pipelined over batch
                pl.BlockSpec((S, H), lambda i: (0, 0)),         # weights stay VMEM-resident
                pl.BlockSpec((1, H), lambda i: (0, 0)),
                pl.BlockSpec((H, A_pad), lambda i: (0, 0)),
                pl.BlockSpec((1, A_pad), lambda i: (0, 0)),
            ],
            out_specs=pl.BlockSpec((TB, A_pad), lambda i: (i, 0)),
        ),
        compiler_params=pltpu.CompilerParams(
            dimension_semantics=("parallel",),                  # shards batch across v7x TCs
            vmem_limit_bytes=32 * 1024 * 1024,                  # safe on v7x's 64 MiB VMEM
        ),
        cost_estimate=pl.CostEstimate(
            flops=2 * Bp * (S * H + H * A_pad),
            transcendentals=Bp * A_pad,
            bytes_accessed=4 * (Bp * S + S * H + H + H * A_pad + A_pad + Bp * A_pad),
        ),
    )(x, w1_t, b1, w2_t, b2)

    return out[:B, :A]


def init_policy_net_params(key, state_dim, hidden_dim, action_dim):
    """Deterministic init mimicking nn.Linear's U(-1/sqrt(fan_in), 1/sqrt(fan_in))."""
    k1, k2, k3, k4 = jax.random.split(key, 4)
    bound1 = 1.0 / jnp.sqrt(state_dim)
    bound2 = 1.0 / jnp.sqrt(hidden_dim)
    # stored already transposed: (in, out)
    w1_t = jax.random.uniform(k1, (state_dim, hidden_dim), jnp.float32, -bound1, bound1)
    b1 = jax.random.uniform(k2, (1, hidden_dim), jnp.float32, -bound1, bound1)
    w2_t = jax.random.uniform(k3, (hidden_dim, action_dim), jnp.float32, -bound2, bound2)
    b2 = jax.random.uniform(k4, (1, action_dim), jnp.float32, -bound2, bound2)
    return w1_t, b1, w2_t, b2


def _reference(x, w1_t, b1, w2_t, b2):
    h = jnp.maximum(x @ w1_t + b1, 0.0)
    return jax.nn.softmax(h @ w2_t + b2, axis=-1)


if __name__ == "__main__":
    # small shapes consistent with the module's forward
    batch, state_dim, hidden_dim, action_dim = 8, 4, 32, 8

    key = jax.random.PRNGKey(0)
    kx, kp = jax.random.split(key)
    x = jax.random.normal(kx, (batch, state_dim), jnp.float32)
    w1_t, b1, w2_t, b2 = init_policy_net_params(kp, state_dim, hidden_dim, action_dim)

    probs = policy_net_forward(x, w1_t, b1, w2_t, b2)
    probs = jax.block_until_ready(probs)

    probs_ref = _reference(x, w1_t, b1, w2_t, b2)
    assert probs.shape == (batch, action_dim)
    assert jnp.allclose(probs, probs_ref, atol=1e-5, rtol=1e-5)
    assert jnp.allclose(jnp.sum(probs, axis=-1), 1.0, atol=1e-5)

    # exercise the batch-tiled / padded path (grid > 1, non-multiple batch)
    x_big = jax.random.normal(jax.random.PRNGKey(1), (1040, state_dim), jnp.float32)
    probs_big = jax.block_until_ready(policy_net_forward(x_big, w1_t, b1, w2_t, b2))
    assert probs_big.shape == (1040, action_dim)
    assert jnp.allclose(probs_big, _reference(x_big, w1_t, b1, w2_t, b2),
                        atol=1e-5, rtol=1e-5)

    print("KERNEL_OK")
</pallas_src>

<mosaic_0001>
module attributes {stable_mosaic.version = 11 : i64} {
  func.func @policy_net_kernel(%arg0: i32, %arg1: memref<8x4xf32, #tpu.memory_space<vmem>>, %arg2: memref<4x32xf32, #tpu.memory_space<vmem>>, %arg3: memref<1x32xf32, #tpu.memory_space<vmem>>, %arg4: memref<32x128xf32, #tpu.memory_space<vmem>>, %arg5: memref<1x128xf32, #tpu.memory_space<vmem>>, %arg6: memref<8x128xf32, #tpu.memory_space<vmem>>) attributes {dimension_semantics = [#tpu.dimension_semantics<parallel>], iteration_bounds = array<i64: 1>, scalar_prefetch = 0 : i64, scratch_operands = 0 : i64, tpu.core_type = #tpu.core_type<tc>, window_params = [{transform_indices = @transform_0, window_bounds = array<i64: 8, 4>}, {pipeline_mode = #tpu.pipeline_mode<synchronous>, transform_indices = @transform_1, window_bounds = array<i64: 4, 32>}, {pipeline_mode = #tpu.pipeline_mode<synchronous>, transform_indices = @transform_2, window_bounds = array<i64: 1, 32>}, {pipeline_mode = #tpu.pipeline_mode<synchronous>, transform_indices = @transform_3, window_bounds = array<i64: 32, 128>}, {pipeline_mode = #tpu.pipeline_mode<synchronous>, transform_indices = @transform_4, window_bounds = array<i64: 1, 128>}, {transform_indices = @transform_5, window_bounds = array<i64: 8, 128>}]} {
    %c0 = arith.constant 0 : index
    %c0_0 = arith.constant 0 : index
    %0 = vector.load %arg1[%c0, %c0_0] : memref<8x4xf32, #tpu.memory_space<vmem>>, vector<8x4xf32>
    %c0_1 = arith.constant 0 : index
    %c0_2 = arith.constant 0 : index
    %1 = vector.load %arg2[%c0_1, %c0_2] : memref<4x32xf32, #tpu.memory_space<vmem>>, vector<4x32xf32>
    %cst = arith.constant dense<0.000000e+00> : vector<8x32xf32>
    %2 = tpu.matmul %0, %1, %cst {dimension_numbers = #tpu.dot_dimension_numbers<[1], [0], [0], [1], [0, 0, 1, 1], [], []>} : vector<8x4xf32>, vector<4x32xf32>, vector<8x32xf32> -> vector<8x32xf32>
    %c0_3 = arith.constant 0 : index
    %c0_4 = arith.constant 0 : index
    %3 = vector.load %arg3[%c0_3, %c0_4] : memref<1x32xf32, #tpu.memory_space<vmem>>, vector<1x32xf32>
    %4 = vector.broadcast %3 : vector<1x32xf32> to vector<8x32xf32>
    %5 = arith.addf %2, %4 : vector<8x32xf32>
    %cst_5 = arith.constant 0.000000e+00 : f32
    %6 = vector.broadcast %cst_5 : f32 to vector<8x32xf32>
    %7 = arith.maximumf %5, %6 : vector<8x32xf32>
    %c0_6 = arith.constant 0 : index
    %c0_7 = arith.constant 0 : index
    %8 = vector.load %arg4[%c0_6, %c0_7] : memref<32x128xf32, #tpu.memory_space<vmem>>, vector<32x128xf32>
    %cst_8 = arith.constant dense<0.000000e+00> : vector<8x128xf32>
    %9 = tpu.matmul %7, %8, %cst_8 {dimension_numbers = #tpu.dot_dimension_numbers<[1], [0], [0], [1], [0, 0, 1, 1], [], []>} : vector<8x32xf32>, vector<32x128xf32>, vector<8x128xf32> -> vector<8x128xf32>
    %c0_9 = arith.constant 0 : index
    %c0_10 = arith.constant 0 : index
    %10 = vector.load %arg5[%c0_9, %c0_10] : memref<1x128xf32, #tpu.memory_space<vmem>>, vector<1x128xf32>
    %11 = vector.broadcast %10 : vector<1x128xf32> to vector<8x128xf32>
    %12 = arith.addf %9, %11 : vector<8x128xf32>
    %13 = tpu.iota {dimensions = array<i32: 1>} : vector<8x128xi32>
    %c8_i32 = arith.constant 8 : i32
    %14 = vector.broadcast %c8_i32 : i32 to vector<8x128xi32>
    %15 = arith.cmpi slt, %13, %14 : vector<8x128xi32>
    %cst_11 = arith.constant -1.000000e+30 : f32
    %16 = vector.broadcast %cst_11 : f32 to vector<8x128xf32>
    %17 = arith.select %15, %12, %16 : vector<8x128xi1>, vector<8x128xf32>
    %cst_12 = arith.constant dense<0xFF800000> : vector<8xf32>
    %18 = vector.multi_reduction <maximumf>, %17, %cst_12 [1] : vector<8x128xf32> to vector<8xf32>
    %19 = vector.shape_cast %18 : vector<8xf32> to vector<8x1xf32>
    %20 = vector.broadcast %19 : vector<8x1xf32> to vector<8x128xf32>
    %21 = arith.subf %17, %20 : vector<8x128xf32>
    %22 = math.exp %21 : vector<8x128xf32>
    %cst_13 = arith.constant dense<0.000000e+00> : vector<8xf32>
    %23 = vector.multi_reduction <add>, %22, %cst_13 [1] : vector<8x128xf32> to vector<8xf32>
    %24 = vector.shape_cast %23 : vector<8xf32> to vector<8x1xf32>
    %25 = tpu.reciprocal %24 {approx = true} : vector<8x1xf32> -> vector<8x1xf32>
    %26 = arith.mulf %24, %25 : vector<8x1xf32>
    %cst_14 = arith.constant 2.000000e+00 : f32
    %27 = vector.broadcast %cst_14 : f32 to vector<8x1xf32>
    %28 = arith.subf %27, %26 : vector<8x1xf32>
    %29 = arith.mulf %25, %28 : vector<8x1xf32>
    %30 = vector.broadcast %29 : vector<8x1xf32> to vector<8x128xf32>
    %31 = arith.mulf %22, %30 : vector<8x128xf32>
    %c0_15 = arith.constant 0 : index
    %c0_16 = arith.constant 0 : index
    %32 = vector.load %arg6[%c0_15, %c0_16] : memref<8x128xf32, #tpu.memory_space<vmem>>, vector<8x128xf32>
    tpu.vector_store %arg6[%c0_15, %c0_16], %31 {strides = array<i32>} : memref<8x128xf32, #tpu.memory_space<vmem>>, vector<8x128xf32>,
    return
  }
  func.func @transform_0(%arg0: i32) -> (i32, i32) {
    %c0_i32 = arith.constant 0 : i32
    %c0_i32_0 = arith.constant 0 : i32
    return %arg0, %c0_i32 : i32, i32
  }
  func.func @transform_1(%arg0: i32) -> (i32, i32) {
    %c0_i32 = arith.constant 0 : i32
    %c0_i32_0 = arith.constant 0 : i32
    %c0_i32_1 = arith.constant 0 : i32
    return %c0_i32, %c0_i32_0 : i32, i32
  }
  func.func @transform_2(%arg0: i32) -> (i32, i32) {
    %c0_i32 = arith.constant 0 : i32
    %c0_i32_0 = arith.constant 0 : i32
    %c0_i32_1 = arith.constant 0 : i32
    return %c0_i32, %c0_i32_0 : i32, i32
  }
  func.func @transform_3(%arg0: i32) -> (i32, i32) {
    %c0_i32 = arith.constant 0 : i32
    %c0_i32_0 = arith.constant 0 : i32
    %c0_i32_1 = arith.constant 0 : i32
    return %c0_i32, %c0_i32_0 : i32, i32
  }
  func.func @transform_4(%arg0: i32) -> (i32, i32) {
    %c0_i32 = arith.constant 0 : i32
    %c0_i32_0 = arith.constant 0 : i32
    %c0_i32_1 = arith.constant 0 : i32
    return %c0_i32, %c0_i32_0 : i32, i32
  }
  func.func @transform_5(%arg0: i32) -> (i32, i32) {
    %c0_i32 = arith.constant 0 : i32
    %c0_i32_0 = arith.constant 0 : i32
    return %arg0, %c0_i32 : i32, i32
  }
}

</mosaic_0001>

<bundles_post_ra>
// kernel: tpu_custom_call.1
= control target key start
LH: loop header
LB: loop body
LE: loop exit
PB: predicated region body
PF: predicated region fallthrough
CT: control target
= control target key end

     0   :  { %10 = vsyncpa [#allocation3], 0  ;;  %s255_s0 = inlined_call_operand.vmem [shape: f32[8,4], index: 0, kind: input, shape index: {}]   ;;  %s256_s1 = inlined_call_operand.vmem [shape: f32[4,32], index: 1, kind: input, shape index: {}]   ;;  %s257_s2 = inlined_call_operand.vmem [shape: f32[1,32], index: 2, kind: input, shape index: {}]   ;;  %s258_s3 = inlined_call_operand.hbm [shape: f32[32,128], index: 3, kind: input, shape index: {}]   ;;  %s259_s4 = inlined_call_operand.vmem [shape: f32[1,128], index: 4, kind: input, shape index: {}]   ;;  %s260_s5 = inlined_call_operand.hbm [shape: f32[8,128], index: 5, kind: output, shape index: {}]  }
   0x1   :  { %11 = vsyncpa [#allocation4], 0  ;;  %s22_s20 = sshll.u32 %s258_s3, 4  ;;  %s203_s21 = smov [#allocation2]   ;;  %s23_s20 = int_to_ptr.hbm [resolvable:$true] %s22_s20 }
   0x2   :  { %s24_s22 = sshll.u32 %s203_s21, 4  ;;  %s204_s23 = smov 128   ;;  %s25_s22 = int_to_ptr.vmem [resolvable:$true] %s24_s22 }
   0x3   :  { %s205_s24 = smov 8  }
   0x4   :  { %30 = dma.hbm_to_vmem [thread:$0]  %s23_s20, 512, %s25_s22, [#allocation3], %s204_s23, %s204_s23, %s205_s24  }
   0x5   :  { %199 = dma.done.wait [#allocation3], 512  }
   0x6   :  { %200 = vsyncadd [#allocation3], 4294966784  ;;  %vm47_vm0 = vcmask 1043456   ;;  %vm43_vm1 = vcmask 31744   ;;  %v38_v0 = vld [vmem:[%s256_s1] sm:$0xf]  ;;  %v104_v10 = vlaneseq }
   0x7   :  { %v37_v1 = vld [vmem:[%s255_s0] sm:$0xff]  ;;  %v75_v2 = vld [vmem:[#allocation2 + $0x18] sm:$0xff]  ;;  %138 = vmatpush.msk.msra.mxu0 %vm47_vm0, %v38_v0  ;;  %v74_v3 = vld [vmem:[#allocation2 + $0x10] sm:$0xff]  ;;  %vm80_vm2 = vcmask 261120   ;;  %s128_s7 = sshll.u32 %s260_s5, 4  ;;  %s129_s7 = int_to_ptr.hbm [resolvable:$true] %s128_s7 }
   0x8   :  { %96 = vmatpush.msra.mxu1 %v75_v2  ;;  %139 = vmatmul.msk.f32.vlgmr.msra.gmra.mxu0 %vm43_vm1, %v37_v1  ;;  %v73_v4 = vld [vmem:[#allocation2 + $0x8] sm:$0xff]  ;;  %v72_v5 = vld [vmem:[#allocation2] sm:$0xff]  ;;  %v105_v11 = vand.u32 127, %v104_v10 }
   0x9   :  { %v145_v6 = vld [vmem:[%s257_s2] ss:$0 sm:$0xff]  ;;  %s206_s2 = smov [#allocation5]  }
   0xa   :  { %97 = vmatpush.msra.mxu1 %v74_v3  ;;  %v146_v12 = vld [vmem:[%s259_s4] ss:$0 sm:$0xff]  ;;  %vm106_vm3 = vcmp.lt.s32.totalorder %v105_v11, 8  ;;  %s126_s30 = sshll.u32 %s206_s2, 4  ;;  %s127_s30 = int_to_ptr.vmem [resolvable:$true] %s126_s30 }
   0xc   :  { %98 = vmatpush.msra.mxu1 %v73_v4 }
   0xe   :  { %99 = vmatpush.msra.mxu1 %v72_v5 }
  0x85   :  { %v68_v7 = vpop.f32.mrf.mxu0 }
  0x86   :  { %v69_v8 = vadd.f32 %v145_v6, %v68_v7 }
  0x88   :  { %v71_v9 = vmax.f32 %v69_v8, 0.0 }
  0x8a   :  { %140 = vmatmul.msk.f32.vlgmr.msra.gmra.mxu1 %vm80_vm2, %v71_v9 }
 0x107   :  { %v101_v13 = vpop.f32.mrf.mxu1 }
 0x108   :  { %v102_v14 = vadd.f32 %v146_v12, %v101_v13 }
 0x10a   :  { %v107_v15 = vsel %vm106_vm3, %v102_v14, -1e+30 }
 0x10b   :  { %108 = vmax.xlane.f32.xlu0 %v107_v15 }
 0x17e   :  { %v109_v16 = vpop.xlane.xlu0 %108 }
 0x17f   :  { %v110_v17 = vsub.f32 %v107_v15, %v109_v16 }
 0x181   :  { %v111_v18 = vmul.f32 1.442695, %v110_v17 }
 0x183   :  { %147 = vpow2.f32 %v111_v18 }
 0x189   :  { %v148_v19 = vpop.eup %147 }
 0x18a   :  { %113 = vadd.xlane.f32.xlu0 %v148_v19 }
 0x1fd   :  { %v114_v20 = vpop.xlane.xlu0 %113 }
 0x1fe   :  { %149 = vrcp.f32 %v114_v20 }
 0x204   :  { %v150_v21 = vpop.eup %149 }
 0x205   :  { %v116_v22 = vmul.f32 %v150_v21, %v114_v20 }
 0x207   :  { %v117_v23 = vsub.f32 2.0, %v116_v22 }
 0x209   :  { %v118_v24 = vmul.f32 %v150_v21, %v117_v23 }
 0x20b   :  { %v119_v25 = vmul.f32 %v148_v19, %v118_v24 }
 0x20d   :  { %120 = vst [vmem:[#allocation5] sm:$0xff] %v119_v25 }
 0x20e   :  { %131 = dma.vmem_to_hbm [thread:$0]  %s127_s30, 128, %s129_s7, [#allocation4]  }
 0x20f   :  { %201 = dma.done.wait [#allocation4], 128  }
 0x210   :  { %202 = vsyncadd [#allocation4], 4294967168 }
 0x211   :  { %136 = vsyncpa [#allocation3], 1 }
 0x212   :  { %137 = vsyncpa [#allocation4], 1 }

</bundles_post_ra>
